<compile_context>
chip_gen: v7x
topology: tpu7x:2x2x1
jax: 0.10.0
libtpu: 0.0.40
codegen_flags: <defaults>
</compile_context>

<pallas_src>
import jax
import jax.numpy as jnp
from jax.experimental import pallas as pl
from jax.experimental.pallas import tpu as pltpu


def _self_attention_kernel(x_ref, w_ref, b_ref, u_ref, out_ref, attn_ref):
    # x_ref   : (BB, T, D) f32   one block of batch rows
    # w_ref   : (D, H)     bf16  (resident)
    # b_ref   : (1, H)     f32   bias row (resident)
    # u_ref   : (1, H)     f32   u row (resident)
    # out_ref : (BB, D)    f32
    # attn_ref: (BB, T)    f32   lane-dense attention weights
    bb, t, d = x_ref.shape
    h = w_ref.shape[1]

    x = x_ref[...]                                   # (BB, T, D) f32
    x2d = x.reshape(bb * t, d)                       # collapse batch into M dim

    # uit = tanh(x @ W + bias): bf16 MXU inputs, f32 accumulation, f32 tanh (EUP)
    uit = jnp.tanh(
        jnp.dot(x2d.astype(jnp.bfloat16), w_ref[...],
                preferred_element_type=jnp.float32) + b_ref[...])       # (BB*T, H)

    # ait = uit @ u  -> VPU multiply + lane reduce (avoid an N=1 MXU matmul)
    ait = jnp.sum(uit.reshape(bb, t, h) * u_ref[...], axis=-1)          # (BB, T)

    # softmax over the sequence axis, kept with T on the lane axis
    m = jnp.max(ait, axis=-1, keepdims=True)                            # (BB, 1)
    e = jnp.exp(ait - m)                                                # (BB, T)
    a = e / jnp.sum(e, axis=-1, keepdims=True)                          # (BB, T)

    attn_ref[...] = a                                                   # lane-dense store

    # pooled output as a batched matmul on the MXU: out[b] = a[b] @ x[b]
    pooled = jnp.einsum("bqt,btd->bqd", a.reshape(bb, 1, t), x,
                        preferred_element_type=jnp.float32)             # (BB, 1, D)
    out_ref[...] = pooled.reshape(bb, d)                                # (BB, D)

    # TODO(synk): optional seq_len masking branch (ait[~mask] = -inf) is not
    # wired in; the reference forward here is exercised with seq_len=None.


def self_attention_pallas(embed, weight_W_w, bias_w, weight_u_w, *, block_b=None):
    """embed: (B, T, D) float32. Returns (output (B, D), attn (B, T))."""
    B, T, D = embed.shape
    H = weight_W_w.shape[1]

    if block_b is None:
        # Batch-block to amortize per-grid-step overhead and feed the MXU with
        # M = block_b*T rows; keep >=2 grid steps when B allows so the batch
        # axis can shard across v7x's 2 TensorCores.
        if B % 16 == 0:
            block_b = 16
        elif B % 8 == 0:
            block_b = 8
        else:
            block_b = B
    assert B % block_b == 0, "block_b must divide the batch size"

    w_bf16 = weight_W_w.astype(jnp.bfloat16)              # bf16 MXU input, cast once
    bias_row = bias_w.reshape(1, H).astype(jnp.float32)
    u_row = weight_u_w.reshape(1, H).astype(jnp.float32)

    grid = (B // block_b,)

    out, attn = pl.pallas_call(
        _self_attention_kernel,
        out_shape=(
            jax.ShapeDtypeStruct((B, D), jnp.float32),
            jax.ShapeDtypeStruct((B, T), jnp.float32),
        ),
        grid_spec=pltpu.PrefetchScalarGridSpec(
            num_scalar_prefetch=0,
            grid=grid,
            in_specs=[
                pl.BlockSpec((block_b, T, D), lambda i: (i, 0, 0)),  # embed block
                pl.BlockSpec((D, H), lambda i: (0, 0)),              # W (resident)
                pl.BlockSpec((1, H), lambda i: (0, 0)),              # bias row
                pl.BlockSpec((1, H), lambda i: (0, 0)),              # u row
            ],
            out_specs=[
                pl.BlockSpec((block_b, D), lambda i: (i, 0)),        # pooled out
                pl.BlockSpec((block_b, T), lambda i: (i, 0)),        # lane-dense attn
            ],
        ),
        compiler_params=pltpu.CompilerParams(
            dimension_semantics=("parallel",)),
    )(embed, w_bf16, bias_row, u_row)

    return out, attn


def _reference(embed, W, bias, u):
    uit = jnp.tanh(jnp.einsum("btd,dh->bth", embed, W) + bias.reshape(1, 1, -1))
    ait = jnp.einsum("bth,ho->bt", uit, u)
    a = jax.nn.softmax(ait, axis=1)
    out = jnp.sum(a[..., None] * embed, axis=1)
    return out, a


if __name__ == "__main__":
    B, T, D, H = 2, 8, 16, 32

    key = jax.random.PRNGKey(0)
    k_embed, k_w, k_b, k_u = jax.random.split(key, 4)

    embed = jax.random.normal(k_embed, (B, T, D), dtype=jnp.float32)
    # deterministic uniform(-0.1, 0.1) init, matching the module's __init__
    weight_W_w = jax.random.uniform(k_w, (D, H), jnp.float32, -0.1, 0.1)
    bias_w = jax.random.uniform(k_b, (H, 1), jnp.float32, -0.1, 0.1)
    weight_u_w = jax.random.uniform(k_u, (H, 1), jnp.float32, -0.1, 0.1)

    out, attn = self_attention_pallas(embed, weight_W_w, bias_w, weight_u_w)
    out = jax.block_until_ready(out)
    attn = jax.block_until_ready(attn)

    ref_out, ref_attn = _reference(embed, weight_W_w, bias_w, weight_u_w)
    assert out.shape == (B, D) and attn.shape == (B, T)

    # softmax rows must normalize exactly (independent of bf16 matmul inputs)
    assert jnp.allclose(jnp.sum(attn, axis=-1), 1.0, atol=1e-5)
    # relaxed tolerance vs the pure-f32 reference: the first matmul uses bf16
    # MXU inputs (f32 accumulation) per the performance review
    assert jnp.allclose(out, ref_out, atol=3e-2, rtol=3e-2)
    assert jnp.allclose(attn, ref_attn, atol=3e-2, rtol=3e-2)

    print("KERNEL_OK")
</pallas_src>

<mosaic_0001>
module attributes {stable_mosaic.version = 11 : i64} {
  func.func @_self_attention_kernel(%arg0: i32, %arg1: memref<2x8x16xf32, #tpu.memory_space<vmem>>, %arg2: memref<16x32xbf16, #tpu.memory_space<vmem>>, %arg3: memref<1x32xf32, #tpu.memory_space<vmem>>, %arg4: memref<1x32xf32, #tpu.memory_space<vmem>>, %arg5: memref<2x16xf32, #tpu.memory_space<vmem>>, %arg6: memref<2x8xf32, #tpu.memory_space<vmem>>) attributes {dimension_semantics = [#tpu.dimension_semantics<parallel>], iteration_bounds = array<i64: 1>, scalar_prefetch = 0 : i64, scratch_operands = 0 : i64, tpu.core_type = #tpu.core_type<tc>, window_params = [{transform_indices = @transform_0, window_bounds = array<i64: 2, 8, 16>}, {pipeline_mode = #tpu.pipeline_mode<synchronous>, transform_indices = @transform_1, window_bounds = array<i64: 16, 32>}, {pipeline_mode = #tpu.pipeline_mode<synchronous>, transform_indices = @transform_2, window_bounds = array<i64: 1, 32>}, {pipeline_mode = #tpu.pipeline_mode<synchronous>, transform_indices = @transform_3, window_bounds = array<i64: 1, 32>}, {transform_indices = @transform_4, window_bounds = array<i64: 2, 16>}, {transform_indices = @transform_5, window_bounds = array<i64: 2, 8>}]} {
    %c0 = arith.constant 0 : index
    %c0_0 = arith.constant 0 : index
    %c0_1 = arith.constant 0 : index
    %0 = vector.load %arg1[%c0, %c0_0, %c0_1] : memref<2x8x16xf32, #tpu.memory_space<vmem>>, vector<2x8x16xf32>
    %1 = vector.shape_cast %0 : vector<2x8x16xf32> to vector<16x16xf32>
    %2 = arith.truncf %1 : vector<16x16xf32> to vector<16x16xbf16>
    %c0_2 = arith.constant 0 : index
    %c0_3 = arith.constant 0 : index
    %3 = vector.load %arg2[%c0_2, %c0_3] : memref<16x32xbf16, #tpu.memory_space<vmem>>, vector<16x32xbf16>
    %cst = arith.constant dense<0.000000e+00> : vector<16x32xf32>
    %4 = tpu.matmul %2, %3, %cst {dimension_numbers = #tpu.dot_dimension_numbers<[1], [0], [0], [1], [0, 0, 1, 1], [], []>} : vector<16x16xbf16>, vector<16x32xbf16>, vector<16x32xf32> -> vector<16x32xf32>
    %c0_4 = arith.constant 0 : index
    %c0_5 = arith.constant 0 : index
    %5 = vector.load %arg3[%c0_4, %c0_5] : memref<1x32xf32, #tpu.memory_space<vmem>>, vector<1x32xf32>
    %6 = vector.broadcast %5 : vector<1x32xf32> to vector<16x32xf32>
    %7 = arith.addf %4, %6 : vector<16x32xf32>
    %8 = math.tanh %7 : vector<16x32xf32>
    %9 = vector.shape_cast %8 : vector<16x32xf32> to vector<2x8x32xf32>
    %c0_6 = arith.constant 0 : index
    %c0_7 = arith.constant 0 : index
    %10 = vector.load %arg4[%c0_6, %c0_7] : memref<1x32xf32, #tpu.memory_space<vmem>>, vector<1x32xf32>
    %11 = vector.shape_cast %10 : vector<1x32xf32> to vector<1x1x32xf32>
    %12 = vector.broadcast %11 : vector<1x1x32xf32> to vector<2x8x32xf32>
    %13 = arith.mulf %9, %12 : vector<2x8x32xf32>
    %cst_8 = arith.constant dense<0.000000e+00> : vector<2x8xf32>
    %14 = vector.multi_reduction <add>, %13, %cst_8 [2] : vector<2x8x32xf32> to vector<2x8xf32>
    %cst_9 = arith.constant dense<0xFF800000> : vector<2xf32>
    %15 = vector.multi_reduction <maximumf>, %14, %cst_9 [1] : vector<2x8xf32> to vector<2xf32>
    %16 = vector.shape_cast %15 : vector<2xf32> to vector<2x1xf32>
    %17 = vector.broadcast %16 : vector<2x1xf32> to vector<2x8xf32>
    %18 = arith.subf %14, %17 : vector<2x8xf32>
    %19 = math.exp %18 : vector<2x8xf32>
    %cst_10 = arith.constant dense<0.000000e+00> : vector<2xf32>
    %20 = vector.multi_reduction <add>, %19, %cst_10 [1] : vector<2x8xf32> to vector<2xf32>
    %21 = vector.shape_cast %20 : vector<2xf32> to vector<2x1xf32>
    %22 = vector.broadcast %21 : vector<2x1xf32> to vector<2x8xf32>
    %23 = arith.divf %19, %22 : vector<2x8xf32>
    %c0_11 = arith.constant 0 : index
    %c0_12 = arith.constant 0 : index
    %24 = vector.load %arg6[%c0_11, %c0_12] : memref<2x8xf32, #tpu.memory_space<vmem>>, vector<2x8xf32>
    tpu.vector_store %arg6[%c0_11, %c0_12], %23 {strides = array<i32>} : memref<2x8xf32, #tpu.memory_space<vmem>>, vector<2x8xf32>,
    %25 = vector.shape_cast %23 : vector<2x8xf32> to vector<2x1x8xf32>
    "tpu.trace_start"() <{level = 10 : i32, message = "bqt,btd->bqd"}> : () -> ()
    %cst_13 = arith.constant dense<0.000000e+00> : vector<2x1x16xf32>
    %26 = tpu.matmul %25, %0, %cst_13 {dimension_numbers = #tpu.dot_dimension_numbers<[2], [1], [1], [2], [0, 0, 0, 1, 1, 2], [0], [0]>} : vector<2x1x8xf32>, vector<2x8x16xf32>, vector<2x1x16xf32> -> vector<2x1x16xf32>
    "tpu.trace_stop"() : () -> ()
    %27 = vector.shape_cast %26 : vector<2x1x16xf32> to vector<2x16xf32>
    %c0_14 = arith.constant 0 : index
    %c0_15 = arith.constant 0 : index
    %28 = vector.load %arg5[%c0_14, %c0_15] : memref<2x16xf32, #tpu.memory_space<vmem>>, vector<2x16xf32>
    tpu.vector_store %arg5[%c0_14, %c0_15], %27 {strides = array<i32>} : memref<2x16xf32, #tpu.memory_space<vmem>>, vector<2x16xf32>,
    return
  }
  func.func @transform_0(%arg0: i32) -> (i32, i32, i32) {
    %c0_i32 = arith.constant 0 : i32
    %c0_i32_0 = arith.constant 0 : i32
    %c0_i32_1 = arith.constant 0 : i32
    return %arg0, %c0_i32, %c0_i32_0 : i32, i32, i32
  }
  func.func @transform_1(%arg0: i32) -> (i32, i32) {
    %c0_i32 = arith.constant 0 : i32
    %c0_i32_0 = arith.constant 0 : i32
    %c0_i32_1 = arith.constant 0 : i32
    return %c0_i32, %c0_i32_0 : i32, i32
  }
  func.func @transform_2(%arg0: i32) -> (i32, i32) {
    %c0_i32 = arith.constant 0 : i32
    %c0_i32_0 = arith.constant 0 : i32
    %c0_i32_1 = arith.constant 0 : i32
    return %c0_i32, %c0_i32_0 : i32, i32
  }
  func.func @transform_3(%arg0: i32) -> (i32, i32) {
    %c0_i32 = arith.constant 0 : i32
    %c0_i32_0 = arith.constant 0 : i32
    %c0_i32_1 = arith.constant 0 : i32
    return %c0_i32, %c0_i32_0 : i32, i32
  }
  func.func @transform_4(%arg0: i32) -> (i32, i32) {
    %c0_i32 = arith.constant 0 : i32
    %c0_i32_0 = arith.constant 0 : i32
    return %arg0, %c0_i32 : i32, i32
  }
  func.func @transform_5(%arg0: i32) -> (i32, i32) {
    %c0_i32 = arith.constant 0 : i32
    %c0_i32_0 = arith.constant 0 : i32
    return %arg0, %c0_i32 : i32, i32
  }
}

</mosaic_0001>

<bundles_post_ra>
// kernel: tpu_custom_call.1
= control target key start
LH: loop header
LB: loop body
LE: loop exit
PB: predicated region body
PF: predicated region fallthrough
CT: control target
= control target key end

     0   :  { %11 = vsyncpa [#allocation3], 0  ;;  %s669_s0 = inlined_call_operand.hbm [shape: f32[2,8,16], index: 0, kind: input, shape index: {}]   ;;  %s670_s1 = inlined_call_operand.hbm [shape: bf16[16,32], index: 1, kind: input, shape index: {}]   ;;  %s671_s2 = inlined_call_operand.vmem [shape: f32[1,32], index: 2, kind: input, shape index: {}]   ;;  %s672_s3 = inlined_call_operand.vmem [shape: f32[1,32], index: 3, kind: input, shape index: {}]   ;;  %s673_s4 = inlined_call_operand.hbm [shape: f32[2,16], index: 4, kind: output, shape index: {0}]   ;;  %s674_s5 = inlined_call_operand.hbm [shape: f32[2,8], index: 5, kind: output, shape index: {1}]  }
   0x1   :  { %12 = vsyncpa [#allocation6], 0 }
   0x2   :  { %13 = vsyncpa [#allocation4], 0 }
   0x3   :  { %14 = vsyncpa [#allocation9], 0  ;;  %s554_s18 = smov [#allocation2]   ;;  %s458_s22 = scalar_lea.hbm %s669_s0, 256 }
   0x4   :  { %s20_s19 = sshll.u32 %s554_s18, 4  ;;  %p459_p0 = scmp.ne.s32.totalorder %s669_s0, %s458_s22  ;;  %s21_s19 = int_to_ptr.vmem [resolvable:$true] %s20_s19 }
   0x5   :  { %p462_p1 = scmp.lt.u32.totalorder %s458_s22, %s669_s0 }
   0x7   :  { %p464_p2 = pnand %p462_p1, %p459_p0 }
   0x9   :  { %467 = shalt.err (!%p464_p2)
}
   0xa   :  { %s468_s27 = scalar_lea.vmem %s21_s19, 256  ;;  %p473_p4 = scmp.lt.s32.totalorder %s21_s19, %s21_s19 }
   0xb   :  { %p469_p3 = scmp.ne.s32.totalorder %s21_s19, %s468_s27  ;;  %p474_p5 = scmp.lt.s32.totalorder %s468_s27, %s468_s27 }
   0xd   :  { %p475_p6 = por %p474_p5, %p473_p4 }
   0xf   :  { %p476_p7 = pnand %p475_p6, %p469_p3 }
  0x11   :  { %479 = shalt.err (!%p476_p7)
}
  0x12   :  { %s555_s28 = smov 128   ;;  %s556_s29 = smov 8  }
  0x13   :  { %26 = dma.hbm_to_vmem [thread:$0]  %s669_s0, 256, %s21_s19, [#allocation3], %s555_s28, %s555_s28, %s556_s29  }
  0x14   :  { %s557_s7 = smov [#allocation5]   ;;  %s480_s11 = scalar_lea.hbm %s670_s1, 128 }
  0x15   :  { %s32_s8 = sshll.u32 %s557_s7, 4  ;;  %p481_p8 = scmp.ne.s32.totalorder %s670_s1, %s480_s11  ;;  %s33_s8 = int_to_ptr.vmem [resolvable:$true] %s32_s8 }
  0x16   :  { %p484_p9 = scmp.lt.u32.totalorder %s480_s11, %s670_s1 }
  0x18   :  { %p486_p10 = pnand %p484_p9, %p481_p8 }
  0x1a   :  { %489 = shalt.err (!%p486_p10)
}
  0x1b   :  { %s490_s16 = scalar_lea.vmem %s33_s8, 128  ;;  %p495_p12 = scmp.lt.s32.totalorder %s33_s8, %s33_s8 }
  0x1c   :  { %p491_p11 = scmp.ne.s32.totalorder %s33_s8, %s490_s16  ;;  %p496_p13 = scmp.lt.s32.totalorder %s490_s16, %s490_s16 }
  0x1e   :  { %p497_p0 = por %p496_p13, %p495_p12 }
  0x20   :  { %p498_p1 = pnand %p497_p0, %p491_p11 }
  0x22   :  { %501 = shalt.err (!%p498_p1)
}
  0x23   :  { %s558_s0 = smov 64   ;;  %s559_s17 = smov 4  }
  0x24   :  { %38 = dma.hbm_to_vmem [thread:$0]  %s670_s1, 128, %s33_s8, [#allocation6], %s558_s0, %s558_s0, %s559_s17  }
  0x25   :  { %546 = dma.done.wait [#allocation3], 256  }
  0x26   :  { %547 = vsyncadd [#allocation3], 4294967040 }
  0x27   :  { %548 = dma.done.wait [#allocation6], 128  }
  0x28   :  { %549 = vsyncadd [#allocation6], 4294967168  ;;  %v560_v0 = vmov 0.0   ;;  %vm561_vm0 = vmmov 0   ;;  %v445_v1 = vld [vmem:[#allocation5] sm:$0xff]   ;;  %v50_v2 = vld [vmem:[#allocation2] sm:$0xff]  ;;  %v133_v19 = vlaneseq }
  0x29   :  { %416 = vmatprep.subr.bf16.mxu0 %v560_v0  ;;  %418 = vmatprep.mubr.msk.bf16.mxu0 %vm561_vm0, %v560_v0  ;;  %v625_v3 = vld [vmem:[#allocation2 + $0x8] sm:$0xff]  ;;  %vm68_vm1 = vcmask 130048   ;;  %v404_v5 = vld [vmem:[%s671_s2] ss:$0 sm:$0xff]  ;;  %vm124_vm2 = vcmask 261120   ;;  %vm143_vm3 = vcmask 1041409  }
  0x2a   :  { %422 = vmatprep.subr.mxu1 %v560_v0  ;;  %424 = vmatprep.mubr.msk.f32.mxu1 %vm561_vm0, %v560_v0  ;;  %v52_v4 = vpack.c.bf16 %v625_v3, %v50_v2  ;;  %v407_v12 = vld [vmem:[%s672_s3] ss:$0 sm:$0xff]  ;;  %v134_v20 = vand.u32 127, %v133_v19  ;;  %v136_v21 = vshrl.u32 %v133_v19, 7  ;;  %vm146_vm4 = vcmask 58368   ;;  %s563_s2 = smov [#allocation8]  }
  0x2b   :  { %417 = vmatpush3.bf16.msra.mxu0 %v445_v1  ;;  %423 = vmatpush3.msra.mxu1 %v50_v2  ;;  %v562_v29 = vmov 0   ;;  %vm222_vm5 = vcmask 64512   ;;  %s390_s3 = sshll.u32 %s563_s2, 4  ;;  %s391_s3 = int_to_ptr.vmem [resolvable:$true] %s390_s3 }
  0x2c   :  { %427 = vmatprep.subr.mxu1 %v560_v0  ;;  %v137_v23 = vsub.s32 %v134_v20, %v136_v21  ;;  %444 = vset.pattern.permute.xlu0 %v562_v29  ;;  %v153_v30 = vsub.s32 0, %v136_v21  ;;  %v157_v31 = vsub.s32 1, %v136_v21  ;;  %s502_s23 = scalar_lea.vmem %s391_s3, 32  ;;  %p507_p3 = scmp.lt.s32.totalorder %s391_s3, %s391_s3 }
  0x2d   :  { %443 = vset.pattern.permute.xlu1 %v562_v29  ;;  %p503_p2 = scmp.ne.s32.totalorder %s391_s3, %s502_s23  ;;  %p508_p4 = scmp.lt.s32.totalorder %s502_s23, %s502_s23 }
  0x2e   :  { %419 = vmatmul.mubr.msk.bf16.vlgmr.msra.gmra.mrb[0].mxu0 %vm68_vm1, %v52_v4 }
  0x2f   :  { %p509_p5 = por %p508_p4, %p507_p3 }
  0x31   :  { %p510_p6 = pnand %p509_p5, %p503_p2 }
 0x101   :  { %v106_v6 = vpop.f32.mrb[0].mxu0 }
 0x102   :  { %v107_v7 = vadd.f32 %v404_v5, %v106_v6  ;;  %v420_v8 = vpop.f32.mrb[1].mxu0 }
 0x103   :  { %v109_v9 = vpop.f32.mrb[2].mxu0 }
 0x104   :  { %446 = vtanh.f32 %v107_v7  ;;  %v110_v10 = vadd.f32 %v404_v5, %v109_v9  ;;  %v421_v11 = vpop.f32.mrb[3].mxu0 }
 0x106   :  { %448 = vtanh.f32 %v110_v10 }
 0x10e   :  { %v447_v13 = vpop.eup %446 }
 0x10f   :  { %v122_v14 = vmul.f32 %v447_v13, %v407_v12 }
 0x110   :  { %v449_v15 = vpop.eup %448 }
 0x111   :  { %v125_v16 = vsel %vm124_vm2, %v122_v14, 0.0  ;;  %v123_v17 = vmul.f32 %v449_v15, %v407_v12 }
 0x112   :  { %126 = vadd.xlane.f32.xlu0 %v125_v16 }
 0x113   :  { %v128_v18 = vsel %vm124_vm2, %v123_v17, 0.0 }
 0x116   :  { %129 = vadd.xlane.f32.xlu0 %v128_v18 }
 0x19f   :  { %v127_v22 = vpop.xlane.xlu0 %126 }
 0x1a0   :  { %v138_v25 = vrot.slane %v127_v22, %v137_v23 }
 0x1a3   :  { %v130_v24 = vpop.xlane.xlu0 %129 }
 0x1a4   :  { %v142_v26 = vrot.slane %v130_v24, %v137_v23 }
 0x1a6   :  { %v144_v27 = vsel %vm143_vm3, %v142_v26, %v138_v25 }
 0x1a7   :  { %v147_v28 = vsel %vm146_vm4, %v144_v27, -inf }
 0x1a8   :  { %148 = vmax.xlane.f32.xlu1 %v147_v28 }
 0x235   :  { %v149_v32 = vpop.xlane.xlu1 %148 }
 0x236   :  { %v154_v33 = vrot.slane %v149_v32, %v153_v30  ;;  %v158_v34 = vrot.slane %v149_v32, %v157_v31 }
 0x238   :  { %v161_v35 = vsub.f32 %v127_v22, %v154_v33  ;;  %v162_v36 = vsub.f32 %v130_v24, %v158_v34 }
 0x23a   :  { %v163_v37 = vmul.f32 1.442695, %v161_v35  ;;  %v165_v38 = vmul.f32 1.442695, %v162_v36 }
 0x23c   :  { %450 = vpow2.f32 %v163_v37 }
 0x23d   :  { %452 = vpow2.f32 %v165_v38 }
 0x246   :  { %v451_v39 = vpop.eup %450 }
 0x247   :  { %v453_v40 = vpop.eup %452  ;;  %170 = vperm.xlu1 %443, %v451_v39  }
 0x248   :  { %173 = vperm.xlu0 %444, %v453_v40  }
 0x2c6   :  { %v171_v41 = vpop.permute.xlu1 %170 }
 0x2c7   :  { %v174_v42 = vpop.permute.xlu0 %173  ;;  %v178_v43 = vrot.slane %v171_v41, %v137_v23 }
 0x2c8   :  { %v182_v44 = vrot.slane %v174_v42, %v137_v23 }
 0x2ca   :  { %v183_v45 = vsel %vm143_vm3, %v182_v44, %v178_v43 }
 0x2cb   :  { %v185_v46 = vsel %vm146_vm4, %v183_v45, 0.0 }
 0x2cc   :  { %186 = vadd.xlane.f32.xlu1 %v185_v46 }
 0x359   :  { %v187_v47 = vpop.xlane.xlu1 %186 }
 0x35a   :  { %v192_v48 = vrot.slane %v187_v47, %v153_v30  ;;  %v196_v49 = vrot.slane %v187_v47, %v157_v31 }
 0x35c   :  { %454 = vrcp.f32 %v192_v48 }
 0x35d   :  { %456 = vrcp.f32 %v196_v49 }
 0x366   :  { %v455_v50 = vpop.eup %454 }
 0x367   :  { %v200_v51 = vmul.f32 %v455_v50, %v451_v39  ;;  %v457_v52 = vpop.eup %456 }
 0x368   :  { %v202_v53 = vmul.f32 %v457_v52, %v453_v40 }
 0x369   :  { %206 = vperm.xlu0 %444, %v200_v51  }
 0x36d   :  { %209 = vperm.xlu0 %444, %v202_v53  }
 0x3e8   :  { %v207_v54 = vpop.permute.xlu0 %206 }
 0x3e9   :  { %v214_v55 = vrot.slane %v207_v54, %v137_v23 }
 0x3eb   :  { %425 = vmatmul.mubr.msk.f32.vlgmr.msra.gmra.mrb[0].mxu1 %vm222_vm5, %v214_v55 }
 0x3ec   :  { %428 = vmatpush3.msra.mxu1 %v625_v3  ;;  %v210_v56 = vpop.permute.xlu0 %209  ;;  %429 = vmatprep.mubr.msk.f32.mxu1 %vm561_vm0, %v560_v0 }
 0x3ed   :  { %v218_v57 = vrot.slane %v210_v56, %v137_v23 }
 0x3ef   :  { %430 = vmatmul.mubr.msk.f32.vlgmr.msra.gmra.mrb[2].mxu1 %vm222_vm5, %v218_v57  ;;  %v219_v58 = vsel %vm143_vm3, %v218_v57, %v214_v55 }
 0x3f0   :  { %221 = vst.msk [vmem:[#allocation8] sm:$0x3] %vm146_vm4, %v219_v58 }
 0x3f1   :  { %513 = shalt.err (!%p510_p6)
}
 0x3f2   :  { %s514_s26 = scalar_lea.hbm %s674_s5, 32 }
 0x3f3   :  { %p515_p7 = scmp.ne.s32.totalorder %s674_s5, %s514_s26  ;;  %p518_p8 = scmp.lt.u32.totalorder %s514_s26, %s674_s5 }
 0x3f5   :  { %p520_p9 = pnand %p518_p8, %p515_p7 }
 0x3f7   :  { %523 = shalt.err (!%p520_p9)
}
 0x3f8   :  { %393 = dma.vmem_to_hbm [thread:$0]  %s391_s3, 32, %s674_s5, [#allocation9]   ;;  %vm372_vm6 = vcmask 123904  }
 0x3f9   :  { %s564_s8 = smov [#allocation7]  }
 0x3fa   :  { %s380_s9 = sshll.u32 %s564_s8, 4  ;;  %s381_s9 = int_to_ptr.vmem [resolvable:$true] %s380_s9 }
 0x3fb   :  { %s524_s10 = scalar_lea.vmem %s381_s9, 32  ;;  %p529_p11 = scmp.lt.s32.totalorder %s381_s9, %s381_s9 }
 0x3fc   :  { %p525_p10 = scmp.ne.s32.totalorder %s381_s9, %s524_s10  ;;  %p530_p12 = scmp.lt.s32.totalorder %s524_s10, %s524_s10 }
 0x3fe   :  { %p531_p13 = por %p530_p12, %p529_p11 }
 0x400   :  { %p532_p0 = pnand %p531_p13, %p525_p10 }
 0x4be   :  { %v291_v59 = vpop.f32.mrb[0].mxu1 }
 0x4bf   :  { %v426_v60 = vpop.f32.mrb[1].mxu1 }
 0x4c2   :  { %v363_v61 = vpop.f32.mrb[2].mxu1 }
 0x4c3   :  { %v369_v62 = vrot.slane %v363_v61, 7  ;;  %v431_v63 = vpop.f32.mrb[3].mxu1 }
 0x4c5   :  { %v370_v0 = vsel %vm143_vm3, %v369_v62, %v291_v59 }
 0x4c6   :  { %373 = vst.msk [vmem:[#allocation7] sm:$0x3] %vm372_vm6, %v370_v0 }
 0x4c7   :  { %535 = shalt.err (!%p532_p0)
}
 0x4c8   :  { %s536_s12 = scalar_lea.hbm %s673_s4, 32 }
 0x4c9   :  { %p537_p1 = scmp.ne.s32.totalorder %s673_s4, %s536_s12  ;;  %p540_p2 = scmp.lt.u32.totalorder %s536_s12, %s673_s4 }
 0x4cb   :  { %p542_p3 = pnand %p540_p2, %p537_p1 }
 0x4cd   :  { %545 = shalt.err (!%p542_p3)
}
 0x4ce   :  { %383 = dma.vmem_to_hbm [thread:$0]  %s381_s9, 32, %s673_s4, [#allocation4]  }
 0x4cf   :  { %550 = dma.done.wait [#allocation4], 32  }
 0x4d0   :  { %551 = vsyncadd [#allocation4], 4294967264 }
 0x4d1   :  { %552 = dma.done.wait [#allocation9], 32  }
 0x4d2   :  { %553 = vsyncadd [#allocation9], 4294967264 }
 0x4d3   :  { %400 = vsyncpa [#allocation3], 1 }
 0x4d4   :  { %401 = vsyncpa [#allocation6], 1 }
 0x4d5   :  { %402 = vsyncpa [#allocation4], 1 }
 0x4d6   :  { %403 = vsyncpa [#allocation9], 1 }

</bundles_post_ra>
